<compile_context>
chip_gen: v6e
topology: v6e:2x2x1
jax: 0.10.0
libtpu: 0.0.40
codegen_flags: <defaults>
</compile_context>

<pallas_src>
import math

import jax
import jax.numpy as jnp
from jax.experimental import pallas as pl
from jax.experimental.pallas import tpu as pltpu

_LANES = 128
_SUBLANES = 8
_SMALL_BYTES = 2 << 20  # <= 2 MiB input -> single-block fast path


def _normalize_tiled_kernel(scale_ref, bias_ref, x_ref, o_ref):
    # scale/bias: SMEM (1,1) per-channel scalars (scale = 1/std, bias = -mean/std)
    o_ref[...] = x_ref[...] * scale_ref[0, 0] + bias_ref[0, 0]


def _normalize_small_kernel(scale_ref, bias_ref, x_ref, o_ref):
    # Whole tensor in one VMEM block; C is tiny (3) so unroll at trace time.
    for c in range(x_ref.shape[0]):
        o_ref[c] = x_ref[c] * scale_ref[c, 0] + bias_ref[c, 0]


def normalize(x, mean, std, *, row_tile=1024):
    """(x - mean) / std with per-leading-channel mean/std (torch view (C,1,1,1))."""
    orig_shape = x.shape
    C = orig_shape[0]
    N = math.prod(orig_shape[1:])
    itemsize = jnp.dtype(x.dtype).itemsize

    mean = jnp.asarray(mean, dtype=jnp.float32).reshape(C)
    std = jnp.asarray(std, dtype=jnp.float32).reshape(C)
    # y = x * (1/std) + (-mean/std): one multiply+add instead of sub+divide.
    scale = (1.0 / std).reshape(C, 1)
    bias = (-mean / std).reshape(C, 1)

    # Lane-dense layout: flatten spatial dims to (rows, 128); round rows up to
    # a multiple of 8 sublanes and of the row tile so the grid divides evenly.
    rows = -(-N // _LANES)
    rows = -(-rows // _SUBLANES) * _SUBLANES
    tr = min(row_tile, rows)
    tr = max(_SUBLANES, (tr // _SUBLANES) * _SUBLANES)
    rows = -(-rows // tr) * tr
    n_pad = rows * _LANES

    x_flat = x.reshape(C, N)
    if n_pad != N:
        x_flat = jnp.pad(x_flat, ((0, 0), (0, n_pad - N)))
    x_tiled = x_flat.reshape(C, rows, _LANES)

    if C * n_pad * itemsize <= _SMALL_BYTES:
        # Fast path: no grid, one DMA in / one DMA out, no per-step overhead.
        out = pl.pallas_call(
            _normalize_small_kernel,
            out_shape=jax.ShapeDtypeStruct((C, rows, _LANES), x.dtype),
            in_specs=[
                pl.BlockSpec(memory_space=pltpu.SMEM),
                pl.BlockSpec(memory_space=pltpu.SMEM),
                pl.BlockSpec(memory_space=pltpu.VMEM),
            ],
            out_specs=pl.BlockSpec(memory_space=pltpu.VMEM),
        )(scale, bias, x_tiled)
    else:
        # Pipelined path: (1, tr, 128) blocks ~= 512 KiB f32 each; in+out
        # double-buffered -> ~2 MiB live VMEM, safe on all generations.
        grid = (C, rows // tr)
        out = pl.pallas_call(
            _normalize_tiled_kernel,
            out_shape=jax.ShapeDtypeStruct((C, rows, _LANES), x.dtype),
            grid_spec=pltpu.PrefetchScalarGridSpec(
                num_scalar_prefetch=0,
                grid=grid,
                in_specs=[
                    pl.BlockSpec((1, 1), lambda c, r: (c, 0),
                                 memory_space=pltpu.SMEM),
                    pl.BlockSpec((1, 1), lambda c, r: (c, 0),
                                 memory_space=pltpu.SMEM),
                    pl.BlockSpec((1, tr, _LANES), lambda c, r: (c, r, 0)),
                ],
                out_specs=pl.BlockSpec((1, tr, _LANES), lambda c, r: (c, r, 0)),
            ),
            compiler_params=pltpu.CompilerParams(
                dimension_semantics=("parallel", "parallel"),
            ),
        )(scale, bias, x_tiled)

    if n_pad != N:
        out = out.reshape(C, n_pad)[:, :N]
    return out.reshape(orig_shape)


if __name__ == "__main__":
    key = jax.random.PRNGKey(0)
    # "ImageNet-style" parameters (module __init__ takes mean/std lists, C=3).
    mean = jnp.array([0.485, 0.456, 0.406], dtype=jnp.float32)
    std = jnp.array([0.229, 0.224, 0.225], dtype=jnp.float32)

    # --- Test 1: small shape (exercises single-block fast path) ---
    C, T, H, W = 3, 4, 16, 16
    x = jax.random.normal(key, (C, T, H, W), dtype=jnp.float32)
    y = normalize(x, mean, std)
    jax.block_until_ready(y)
    y_ref = (x - mean.reshape(3, 1, 1, 1)) / std.reshape(3, 1, 1, 1)
    assert y.shape == x.shape
    assert jnp.allclose(y, y_ref, rtol=1e-5, atol=1e-5), "small-path mismatch"

    # --- Test 2: larger shape with a ragged tail (exercises tiled path + padding) ---
    C2, T2, H2, W2 = 3, 8, 192, 127  # T*H*W not a multiple of 1024 -> padded tail
    x2 = jax.random.normal(jax.random.PRNGKey(1), (C2, T2, H2, W2), dtype=jnp.float32)
    y2 = normalize(x2, mean, std)
    jax.block_until_ready(y2)
    y2_ref = (x2 - mean.reshape(3, 1, 1, 1)) / std.reshape(3, 1, 1, 1)
    assert y2.shape == x2.shape
    assert jnp.allclose(y2, y2_ref, rtol=1e-5, atol=1e-5), "tiled-path mismatch"

    print("KERNEL_OK")
</pallas_src>

<mosaic_0001>
module attributes {stable_mosaic.version = 11 : i64} {
  func.func @_normalize_small_kernel(%arg0: memref<3x1xf32, #tpu.memory_space<smem>>, %arg1: memref<3x1xf32, #tpu.memory_space<smem>>, %arg2: memref<3x8x128xf32, #tpu.memory_space<vmem>>, %arg3: memref<3x8x128xf32, #tpu.memory_space<vmem>>) attributes {dimension_semantics = [], scalar_prefetch = 0 : i64, scratch_operands = 0 : i64, tpu.core_type = #tpu.core_type<tc>} {
    %c0 = arith.constant 0 : index
    %c0_0 = arith.constant 0 : index
    %c0_1 = arith.constant 0 : index
    %0 = vector.load %arg2[%c0, %c0_0, %c0_1] : memref<3x8x128xf32, #tpu.memory_space<vmem>>, vector<1x8x128xf32>
    %1 = vector.shape_cast %0 : vector<1x8x128xf32> to vector<8x128xf32>
    %c0_2 = arith.constant 0 : index
    %c0_3 = arith.constant 0 : index
    %2 = memref.load %arg0[%c0_2, %c0_3] : memref<3x1xf32, #tpu.memory_space<smem>>
    %3 = vector.broadcast %2 : f32 to vector<8x128xf32>
    %4 = arith.mulf %1, %3 : vector<8x128xf32>
    %c0_4 = arith.constant 0 : index
    %c0_5 = arith.constant 0 : index
    %5 = memref.load %arg1[%c0_4, %c0_5] : memref<3x1xf32, #tpu.memory_space<smem>>
    %6 = vector.broadcast %5 : f32 to vector<8x128xf32>
    %7 = arith.addf %4, %6 : vector<8x128xf32>
    %c0_6 = arith.constant 0 : index
    %c0_7 = arith.constant 0 : index
    %c0_8 = arith.constant 0 : index
    %8 = vector.load %arg3[%c0_6, %c0_7, %c0_8] : memref<3x8x128xf32, #tpu.memory_space<vmem>>, vector<1x8x128xf32>
    %9 = vector.shape_cast %8 : vector<1x8x128xf32> to vector<8x128xf32>
    %10 = vector.shape_cast %7 : vector<8x128xf32> to vector<1x8x128xf32>
    tpu.vector_store %arg3[%c0_6, %c0_7, %c0_8], %10 {strides = array<i32>} : memref<3x8x128xf32, #tpu.memory_space<vmem>>, vector<1x8x128xf32>,
    %c1 = arith.constant 1 : index
    %c0_9 = arith.constant 0 : index
    %c0_10 = arith.constant 0 : index
    %11 = vector.load %arg2[%c1, %c0_9, %c0_10] : memref<3x8x128xf32, #tpu.memory_space<vmem>>, vector<1x8x128xf32>
    %12 = vector.shape_cast %11 : vector<1x8x128xf32> to vector<8x128xf32>
    %c1_11 = arith.constant 1 : index
    %c0_12 = arith.constant 0 : index
    %13 = memref.load %arg0[%c1_11, %c0_12] : memref<3x1xf32, #tpu.memory_space<smem>>
    %14 = vector.broadcast %13 : f32 to vector<8x128xf32>
    %15 = arith.mulf %12, %14 : vector<8x128xf32>
    %c1_13 = arith.constant 1 : index
    %c0_14 = arith.constant 0 : index
    %16 = memref.load %arg1[%c1_13, %c0_14] : memref<3x1xf32, #tpu.memory_space<smem>>
    %17 = vector.broadcast %16 : f32 to vector<8x128xf32>
    %18 = arith.addf %15, %17 : vector<8x128xf32>
    %c1_15 = arith.constant 1 : index
    %c0_16 = arith.constant 0 : index
    %c0_17 = arith.constant 0 : index
    %19 = vector.load %arg3[%c1_15, %c0_16, %c0_17] : memref<3x8x128xf32, #tpu.memory_space<vmem>>, vector<1x8x128xf32>
    %20 = vector.shape_cast %19 : vector<1x8x128xf32> to vector<8x128xf32>
    %21 = vector.shape_cast %18 : vector<8x128xf32> to vector<1x8x128xf32>
    tpu.vector_store %arg3[%c1_15, %c0_16, %c0_17], %21 {strides = array<i32>} : memref<3x8x128xf32, #tpu.memory_space<vmem>>, vector<1x8x128xf32>,
    %c2 = arith.constant 2 : index
    %c0_18 = arith.constant 0 : index
    %c0_19 = arith.constant 0 : index
    %22 = vector.load %arg2[%c2, %c0_18, %c0_19] : memref<3x8x128xf32, #tpu.memory_space<vmem>>, vector<1x8x128xf32>
    %23 = vector.shape_cast %22 : vector<1x8x128xf32> to vector<8x128xf32>
    %c2_20 = arith.constant 2 : index
    %c0_21 = arith.constant 0 : index
    %24 = memref.load %arg0[%c2_20, %c0_21] : memref<3x1xf32, #tpu.memory_space<smem>>
    %25 = vector.broadcast %24 : f32 to vector<8x128xf32>
    %26 = arith.mulf %23, %25 : vector<8x128xf32>
    %c2_22 = arith.constant 2 : index
    %c0_23 = arith.constant 0 : index
    %27 = memref.load %arg1[%c2_22, %c0_23] : memref<3x1xf32, #tpu.memory_space<smem>>
    %28 = vector.broadcast %27 : f32 to vector<8x128xf32>
    %29 = arith.addf %26, %28 : vector<8x128xf32>
    %c2_24 = arith.constant 2 : index
    %c0_25 = arith.constant 0 : index
    %c0_26 = arith.constant 0 : index
    %30 = vector.load %arg3[%c2_24, %c0_25, %c0_26] : memref<3x8x128xf32, #tpu.memory_space<vmem>>, vector<1x8x128xf32>
    %31 = vector.shape_cast %30 : vector<1x8x128xf32> to vector<8x128xf32>
    %32 = vector.shape_cast %29 : vector<8x128xf32> to vector<1x8x128xf32>
    tpu.vector_store %arg3[%c2_24, %c0_25, %c0_26], %32 {strides = array<i32>} : memref<3x8x128xf32, #tpu.memory_space<vmem>>, vector<1x8x128xf32>,
    return
  }
}

</mosaic_0001>

<bundles_post_ra>
// kernel: tpu_custom_call.1
= control target key start
LH: loop header
LB: loop body
LE: loop exit
PB: predicated region body
PF: predicated region fallthrough
CT: control target
= control target key end

     0   :  { %8 = vsyncpa [#allocation5], 0  ;;  %s227_s0 = inlined_call_operand.vmem [shape: f32[3,1], index: 0, kind: input, shape index: {}]   ;;  %s228_s1 = inlined_call_operand.vmem [shape: f32[3,1], index: 1, kind: input, shape index: {}]   ;;  %s229_s2 = inlined_call_operand.hbm [shape: f32[3,8,128], index: 2, kind: input, shape index: {}]   ;;  %s230_s3 = inlined_call_operand.hbm [shape: f32[3,8,128], index: 3, kind: output, shape index: {}]  }
   0x1   :  { %9 = vsyncpa [#allocation7], 0 }
   0x2   :  { %10 = vsyncpa [#allocation3], 0 }
   0x3   :  { %11 = vsyncpa [#allocation4], 0  ;;  %s18_s14 = sshll.u32 %s227_s0, 4  ;;  %s28_s17 = sshll.u32 %s228_s1, 4  ;;  %s19_s14 = int_to_ptr.vmem [resolvable:$true] %s18_s14  ;;  %s29_s17 = int_to_ptr.vmem [resolvable:$true] %s28_s17 }
   0x4   :  { %s111_s18 = scalar_lea.vmem %s19_s14, 64  ;;  %p116_p1 = scmp.lt.s32.totalorder %s19_s14, %s19_s14 }
   0x5   :  { %p112_p0 = scmp.ne.s32.totalorder %s19_s14, %s111_s18  ;;  %p117_p2 = scmp.lt.s32.totalorder %s111_s18, %s111_s18 }
   0x7   :  { %p118_p3 = por %p117_p2, %p116_p1 }
   0x9   :  { %p119_p4 = pnand %p118_p3, %p112_p0 }
   0xb   :  { %122 = shalt.err (!%p119_p4)
}
   0xc   :  { %s183_s19 = smov [#allocation2]   ;;  %s123_s20 = scalar_lea.vmem %s29_s17, 64 }
   0xd   :  { %21 = dma.vmem_to_smem %s19_s14, 64, %s183_s19, [#allocation5]  }
   0xe   :  { %p124_p5 = scmp.ne.s32.totalorder %s29_s17, %s123_s20  ;;  %p128_p6 = scmp.lt.s32.totalorder %s29_s17, %s29_s17 }
   0xf   :  { %p129_p7 = scmp.lt.s32.totalorder %s123_s20, %s123_s20 }
  0x11   :  { %p130_p8 = por %p129_p7, %p128_p6 }
  0x13   :  { %p131_p9 = pnand %p130_p8, %p124_p5 }
  0x15   :  { %134 = shalt.err (!%p131_p9)
}
  0x16   :  { %s184_s0 = smov [#allocation6]   ;;  %s185_s1 = smov [#allocation8]  }
  0x17   :  { %31 = dma.vmem_to_smem %s29_s17, 64, %s184_s0, [#allocation7]  }
  0x18   :  { %s37_s21 = sshll.u32 %s185_s1, 4  ;;  %s38_s21 = int_to_ptr.vmem [resolvable:$true] %s37_s21 }
  0x19   :  { %s143_s22 = scalar_lea.vmem %s38_s21, 384  ;;  %p148_p11 = scmp.lt.s32.totalorder %s38_s21, %s38_s21 }
  0x1a   :  { %p144_p10 = scmp.ne.s32.totalorder %s38_s21, %s143_s22  ;;  %p149_p12 = scmp.lt.s32.totalorder %s143_s22, %s143_s22 }
  0x1c   :  { %p150_p13 = por %p149_p12, %p148_p11 }
  0x1e   :  { %p151_p0 = pnand %p150_p13, %p144_p10 }
  0x20   :  { %154 = shalt.err (!%p151_p0)
}
  0x21   :  { %s186_s23 = smov 128   ;;  %s187_s24 = smov 8  }
  0x22   :  { %43 = dma.hbm_to_vmem [thread:$0]  %s229_s2, 384, %s38_s21, [#allocation3], %s186_s23, %s186_s23, %s187_s24  }
  0x23   :  { %175 = dma.done.wait [#allocation5], 64  }
  0x24   :  { %176 = vsyncadd [#allocation5], 4294967232 }
  0x25   :  { %177 = dma.done.wait [#allocation7], 64  }
  0x26   :  { %178 = vsyncadd [#allocation7], 4294967232 }
  0x27   :  { %179 = dma.done.wait [#allocation3], 384  }
  0x28   :  { %180 = vsyncadd [#allocation3], 4294966912 }
  0x29   :  { %53 = sfence }
  0x2a   :  { %s55_s27 = sld [smem:[#allocation2]]  ;;  %v54_v0 = vld [vmem:[#allocation8] sm:$0xff]  ;;  %v63_v2 = vld [vmem:[#allocation8 + $0x8] sm:$0xff]  ;;  %v73_v6 = vld [vmem:[#allocation8 + $0x10] sm:$0xff]  ;;  %s188_s2 = smov [#allocation9]  }
  0x2b   :  { %s58_s28 = sld [smem:[#allocation6]]  ;;  %s87_s6 = sshll.u32 %s188_s2, 4  ;;  %s88_s6 = int_to_ptr.vmem [resolvable:$true] %s87_s6 }
  0x2c   :  { %s101_s29 = sld [smem:[#allocation2 + $0x80]]  ;;  %s155_s7 = scalar_lea.vmem %s88_s6, 384 }
  0x2d   :  { %s102_s30 = sld [smem:[#allocation6 + $0x80]]  ;;  %p156_p1 = scmp.ne.s32.totalorder %s88_s6, %s155_s7 }
  0x2e   :  { %s103_s4 = sld [smem:[#allocation2 + $0x100]]  ;;  %p160_p2 = scmp.lt.s32.totalorder %s88_s6, %s88_s6 }
  0x2f   :  { %s104_s5 = sld [smem:[#allocation6 + $0x100]]  ;;  %p161_p3 = scmp.lt.s32.totalorder %s155_s7, %s155_s7 }
  0x30   :  { %v56_v1 = vstv %s55_s27 }
  0x31   :  { %v57_v3 = vmul.f32 %v56_v1, %v54_v0  ;;  %v59_v4 = vstv %s58_s28  ;;  %p162_p4 = por %p161_p3, %p160_p2 }
  0x32   :  { %v65_v5 = vstv %s101_s29 }
  0x33   :  { %v60_v7 = vadd.f32 %v59_v4, %v57_v3  ;;  %v66_v8 = vmul.f32 %v65_v5, %v63_v2  ;;  %v68_v9 = vstv %s102_s30  ;;  %p163_p5 = pnand %p162_p4, %p156_p1 }
  0x34   :  { %v75_v10 = vstv %s103_s4 }
  0x35   :  { %61 = vst [vmem:[#allocation9] sm:$0xff] %v60_v7  ;;  %v69_v11 = vadd.f32 %v68_v9, %v66_v8  ;;  %v76_v12 = vmul.f32 %v75_v10, %v73_v6  ;;  %v78_v13 = vstv %s104_s5 }
  0x37   :  { %71 = vst [vmem:[#allocation9 + $0x8] sm:$0xff] %v69_v11  ;;  %v79_v14 = vadd.f32 %v78_v13, %v76_v12 }
  0x39   :  { %81 = vst [vmem:[#allocation9 + $0x10] sm:$0xff] %v79_v14 }
  0x3a   :  { %166 = shalt.err (!%p163_p5)
}
  0x3b   :  { %93 = dma.vmem_to_hbm [thread:$0]  %s88_s6, 384, %s230_s3, [#allocation4], %s186_s23, %s186_s23, %s187_s24  }
  0x3c   :  { %181 = dma.done.wait [#allocation4], 384  }
  0x3d   :  { %182 = vsyncadd [#allocation4], 4294966912 }
  0x3e   :  { %97 = vsyncpa [#allocation3], 1 }
  0x3f   :  { %98 = vsyncpa [#allocation4], 1 }
  0x40   :  { %99 = vsyncpa [#allocation5], 1 }
  0x41   :  { %100 = vsyncpa [#allocation7], 1 }

</bundles_post_ra>
